<compile_context>
chip_gen: v6e
topology: v6e:2x2x1
jax: 0.10.0
libtpu: 0.0.40
codegen_flags: <defaults>
</compile_context>

<pallas_src>
import math

import jax
import jax.numpy as jnp
from jax.experimental import pallas as pl
from jax.experimental.pallas import tpu as pltpu


def _round_up(x, m):
    return ((x + m - 1) // m) * m


def _make_generator_kernel(num_layers, in_dim_pad, compute_dtype):
    """Kernel body: full MLP (matmul + bias + ReLU chain) on one batch tile.

    Refs: x_ref (tm, in_dim_pad), w_ref (L, P, P), b_ref (L, 1, P),
          out_ref (tm, P).
    ReLU after every layer except the last (matches the PyTorch module).
    """

    def kernel(x_ref, w_ref, b_ref, out_ref):
        h = x_ref[...]                                  # (tm, in_dim_pad) f32
        for layer in range(num_layers):                 # static unroll
            if layer == 0:
                # First layer: only the first in_dim_pad rows of the padded
                # weight are live; static sublane-aligned slice -> no copy.
                w = w_ref[0, :in_dim_pad, :]            # (in_dim_pad, P)
            else:
                w = w_ref[layer]                        # (P, P)
            b = b_ref[layer]                            # (1, P) f32
            h = jnp.dot(h.astype(compute_dtype), w,
                        preferred_element_type=jnp.float32) + b
            if layer != num_layers - 1:
                h = jnp.maximum(h, 0.0)                 # ReLU on the VPU (f32)
        out_ref[...] = h.astype(out_ref.dtype)

    return kernel


def pack_generator_params(params, compute_dtype=jnp.float32):
    """Zero-pad every layer to a common lane-aligned width P and stack.

    params : list of (W, b) with W: (in, out), b: (1, out)
    compute_dtype : dtype of the stacked weights fed to the MXU
                    (f32 for exactness; bf16 for v6e/v7x throughput).
    returns: dict with W_stack (L, P, P), b_stack (L, 1, P), P, in_dim(_pad),
             out_dim, num_layers, compute_dtype.
    """
    num_layers = len(params)
    dims = [params[0][0].shape[0]] + [w.shape[1] for w, _ in params]
    P = max(_round_up(d, 128) for d in dims)
    in_dim = dims[0]
    in_dim_pad = max(_round_up(in_dim, 8), 8)   # sublane granule for f32 x

    w_stack = jnp.zeros((num_layers, P, P), jnp.float32)
    b_stack = jnp.zeros((num_layers, 1, P), jnp.float32)
    for i, (w, b) in enumerate(params):
        fi, fo = w.shape
        w_stack = w_stack.at[i, :fi, :fo].set(jnp.asarray(w, jnp.float32))
        b_stack = b_stack.at[i, :1, :fo].set(jnp.asarray(b, jnp.float32))

    return {
        "w_stack": w_stack.astype(compute_dtype),
        "b_stack": b_stack,                      # bias add stays f32
        "P": P,
        "in_dim": in_dim,
        "in_dim_pad": in_dim_pad,
        "out_dim": dims[-1],
        "num_layers": num_layers,
        "compute_dtype": compute_dtype,
    }


def _choose_batch_tiling(B):
    """Pick (tm, B_pad).  Single tile for small B; >=2 grid steps otherwise
    so v7x's two TensorCores both get work; tile capped at 2048 rows."""
    if B <= 256:
        tm = max(_round_up(B, 8), 8)
        return tm, tm
    tm = min(2048, _round_up(-(-B // 2), 256))   # ceil(B/2) rounded to 256
    return tm, _round_up(B, tm)


def generator_forward(x, packed, slice_output=True):
    """Run the Generator MLP as a single Pallas TPU kernel.

    x            : (B, latent_dim) float
    packed       : output of pack_generator_params
    slice_output : if True return (B, pose_dim); if False return the padded
                   lane-dense (B_pad, P) buffer (lets a consumer fuse the
                   slice and skip an extra HBM pass).
    """
    w_stack = packed["w_stack"]
    b_stack = packed["b_stack"]
    P = packed["P"]
    in_dim = packed["in_dim"]
    in_dim_pad = packed["in_dim_pad"]
    out_dim = packed["out_dim"]
    num_layers = packed["num_layers"]
    compute_dtype = packed["compute_dtype"]

    B = x.shape[0]
    tm, B_pad = _choose_batch_tiling(B)
    grid = (B_pad // tm,)

    # x keeps its natural (narrow) feature width; pad only if the batch or the
    # sublane granule actually require it (fast path: no pad op at all).
    x = jnp.asarray(x, jnp.float32)
    if B_pad == B and in_dim_pad == in_dim:
        x_in = x
    else:
        x_in = jnp.zeros((B_pad, in_dim_pad), jnp.float32)
        x_in = x_in.at[:B, :in_dim].set(x)

    kernel = _make_generator_kernel(num_layers, in_dim_pad, compute_dtype)

    out_pad = pl.pallas_call(
        kernel,
        out_shape=jax.ShapeDtypeStruct((B_pad, P), jnp.float32),
        grid=grid,
        in_specs=[
            # x tile moves with the grid step; its last dim equals the full
            # array dim (narrow natural width) so the block is legal.
            pl.BlockSpec((tm, in_dim_pad), lambda i: (i, 0)),
            # Weight / bias slabs: constant block index -> VMEM-resident
            # across all grid iterations (no re-DMA).
            pl.BlockSpec((num_layers, P, P), lambda i: (0, 0, 0)),
            pl.BlockSpec((num_layers, 1, P), lambda i: (0, 0, 0)),
        ],
        out_specs=pl.BlockSpec((tm, P), lambda i: (i, 0)),
        compiler_params=pltpu.CompilerParams(
            dimension_semantics=("parallel",),
            vmem_limit_bytes=32 * 1024 * 1024,
        ),
    )(x_in, w_stack, b_stack)

    if slice_output:
        return out_pad[:B, :out_dim]
    return out_pad


def init_generator_params(key, latent_dim, dense_layer_sizes, pose_dim):
    """Deterministic init mimicking PyTorch nn.Linear default
    (uniform(-1/sqrt(fan_in), 1/sqrt(fan_in)) for both weight and bias).
    Weights are stored (in, out) so y = x @ W + b."""
    layer_dims = [latent_dim] + list(dense_layer_sizes) + [pose_dim]
    params = []
    for i in range(len(layer_dims) - 1):
        fan_in, fan_out = layer_dims[i], layer_dims[i + 1]
        bound = 1.0 / math.sqrt(fan_in)
        key, kw, kb = jax.random.split(key, 3)
        w = jax.random.uniform(kw, (fan_in, fan_out), jnp.float32, -bound, bound)
        b = jax.random.uniform(kb, (1, fan_out), jnp.float32, -bound, bound)
        params.append((w, b))
    return params


def generator_forward_ref(x, params):
    """Pure-JAX reference for correctness checking."""
    h = x
    for i, (w, b) in enumerate(params):
        h = h @ w + b
        if i != len(params) - 1:
            h = jnp.maximum(h, 0.0)
    return h


if __name__ == "__main__":
    # Small shapes consistent with the module:
    #   latent_dim = 8, dense_layer_sizes = [32, 64],
    #   pose_dim = joint_count * joint_dim = 16 * 3 = 48, batch = 2.
    latent_dim = 8
    dense_layer_sizes = [32, 64]
    joint_count, joint_dim = 16, 3
    pose_dim = joint_count * joint_dim
    batch = 2

    key = jax.random.PRNGKey(0)
    key, kx = jax.random.split(key)
    x = jax.random.normal(kx, (batch, latent_dim), jnp.float32)

    params = init_generator_params(key, latent_dim, dense_layer_sizes, pose_dim)

    # f32 path (exact): tight tolerance vs. pure-JAX reference.
    packed_f32 = pack_generator_params(params, compute_dtype=jnp.float32)
    out = jax.block_until_ready(generator_forward(x, packed_f32))
    ref = jax.block_until_ready(generator_forward_ref(x, params))
    assert out.shape == (batch, pose_dim)
    assert jnp.allclose(out, ref, atol=1e-5, rtol=1e-5), "mismatch vs reference"

    # Batched / multi-grid-step path (grid >= 2, both TCs busy on v7x).
    big_batch = 1024
    key, kx2 = jax.random.split(key)
    xb = jax.random.normal(kx2, (big_batch, latent_dim), jnp.float32)
    out_b = jax.block_until_ready(generator_forward(xb, packed_f32))
    ref_b = jax.block_until_ready(generator_forward_ref(xb, params))
    assert out_b.shape == (big_batch, pose_dim)
    assert jnp.allclose(out_b, ref_b, atol=1e-5, rtol=1e-5), "batched mismatch vs reference"

    # bf16-MXU path (v6e/v7x throughput lever): looser, bf16-appropriate check.
    packed_bf16 = pack_generator_params(params, compute_dtype=jnp.bfloat16)
    out_bf = jax.block_until_ready(generator_forward(xb, packed_bf16))
    assert out_bf.shape == (big_batch, pose_dim)
    assert jnp.allclose(out_bf, ref_b, atol=5e-2, rtol=5e-2), "bf16 mismatch vs reference"

    print("KERNEL_OK")
</pallas_src>

<mosaic_0001>
module attributes {stable_mosaic.version = 11 : i64} {
  func.func @kernel(%arg0: i32, %arg1: memref<8x8xf32, #tpu.memory_space<vmem>>, %arg2: memref<3x128x128xf32, #tpu.memory_space<vmem>>, %arg3: memref<3x1x128xf32, #tpu.memory_space<vmem>>, %arg4: memref<8x128xf32, #tpu.memory_space<vmem>>) attributes {dimension_semantics = [#tpu.dimension_semantics<parallel>], iteration_bounds = array<i64: 1>, scalar_prefetch = 0 : i64, scratch_operands = 0 : i64, tpu.core_type = #tpu.core_type<tc>, window_params = [{transform_indices = @transform_0, window_bounds = array<i64: 8, 8>}, {pipeline_mode = #tpu.pipeline_mode<synchronous>, transform_indices = @transform_1, window_bounds = array<i64: 3, 128, 128>}, {pipeline_mode = #tpu.pipeline_mode<synchronous>, transform_indices = @transform_2, window_bounds = array<i64: 3, 1, 128>}, {transform_indices = @transform_3, window_bounds = array<i64: 8, 128>}]} {
    %c0 = arith.constant 0 : index
    %c0_0 = arith.constant 0 : index
    %0 = vector.load %arg1[%c0, %c0_0] : memref<8x8xf32, #tpu.memory_space<vmem>>, vector<8x8xf32>
    %c0_1 = arith.constant 0 : index
    %c0_2 = arith.constant 0 : index
    %c0_3 = arith.constant 0 : index
    %1 = vector.load %arg2[%c0_1, %c0_2, %c0_3] : memref<3x128x128xf32, #tpu.memory_space<vmem>>, vector<1x8x128xf32>
    %2 = vector.shape_cast %1 : vector<1x8x128xf32> to vector<8x128xf32>
    %c0_4 = arith.constant 0 : index
    %c0_5 = arith.constant 0 : index
    %c0_6 = arith.constant 0 : index
    %3 = vector.load %arg3[%c0_4, %c0_5, %c0_6] : memref<3x1x128xf32, #tpu.memory_space<vmem>>, vector<1x1x128xf32>
    %4 = vector.shape_cast %3 : vector<1x1x128xf32> to vector<1x128xf32>
    %cst = arith.constant dense<0.000000e+00> : vector<8x128xf32>
    %5 = tpu.matmul %0, %2, %cst {dimension_numbers = #tpu.dot_dimension_numbers<[1], [0], [0], [1], [0, 0, 1, 1], [], []>} : vector<8x8xf32>, vector<8x128xf32>, vector<8x128xf32> -> vector<8x128xf32>
    %6 = vector.broadcast %4 : vector<1x128xf32> to vector<8x128xf32>
    %7 = arith.addf %5, %6 : vector<8x128xf32>
    %cst_7 = arith.constant 0.000000e+00 : f32
    %8 = vector.broadcast %cst_7 : f32 to vector<8x128xf32>
    %9 = arith.maximumf %7, %8 : vector<8x128xf32>
    %c1 = arith.constant 1 : index
    %c0_8 = arith.constant 0 : index
    %c0_9 = arith.constant 0 : index
    %10 = vector.load %arg2[%c1, %c0_8, %c0_9] : memref<3x128x128xf32, #tpu.memory_space<vmem>>, vector<1x128x128xf32>
    %11 = vector.shape_cast %10 : vector<1x128x128xf32> to vector<128x128xf32>
    %c1_10 = arith.constant 1 : index
    %c0_11 = arith.constant 0 : index
    %c0_12 = arith.constant 0 : index
    %12 = vector.load %arg3[%c1_10, %c0_11, %c0_12] : memref<3x1x128xf32, #tpu.memory_space<vmem>>, vector<1x1x128xf32>
    %13 = vector.shape_cast %12 : vector<1x1x128xf32> to vector<1x128xf32>
    %cst_13 = arith.constant dense<0.000000e+00> : vector<8x128xf32>
    %14 = tpu.matmul %9, %11, %cst_13 {dimension_numbers = #tpu.dot_dimension_numbers<[1], [0], [0], [1], [0, 0, 1, 1], [], []>} : vector<8x128xf32>, vector<128x128xf32>, vector<8x128xf32> -> vector<8x128xf32>
    %15 = vector.broadcast %13 : vector<1x128xf32> to vector<8x128xf32>
    %16 = arith.addf %14, %15 : vector<8x128xf32>
    %cst_14 = arith.constant 0.000000e+00 : f32
    %17 = vector.broadcast %cst_14 : f32 to vector<8x128xf32>
    %18 = arith.maximumf %16, %17 : vector<8x128xf32>
    %c2 = arith.constant 2 : index
    %c0_15 = arith.constant 0 : index
    %c0_16 = arith.constant 0 : index
    %19 = vector.load %arg2[%c2, %c0_15, %c0_16] : memref<3x128x128xf32, #tpu.memory_space<vmem>>, vector<1x128x128xf32>
    %20 = vector.shape_cast %19 : vector<1x128x128xf32> to vector<128x128xf32>
    %c2_17 = arith.constant 2 : index
    %c0_18 = arith.constant 0 : index
    %c0_19 = arith.constant 0 : index
    %21 = vector.load %arg3[%c2_17, %c0_18, %c0_19] : memref<3x1x128xf32, #tpu.memory_space<vmem>>, vector<1x1x128xf32>
    %22 = vector.shape_cast %21 : vector<1x1x128xf32> to vector<1x128xf32>
    %cst_20 = arith.constant dense<0.000000e+00> : vector<8x128xf32>
    %23 = tpu.matmul %18, %20, %cst_20 {dimension_numbers = #tpu.dot_dimension_numbers<[1], [0], [0], [1], [0, 0, 1, 1], [], []>} : vector<8x128xf32>, vector<128x128xf32>, vector<8x128xf32> -> vector<8x128xf32>
    %24 = vector.broadcast %22 : vector<1x128xf32> to vector<8x128xf32>
    %25 = arith.addf %23, %24 : vector<8x128xf32>
    %c0_21 = arith.constant 0 : index
    %c0_22 = arith.constant 0 : index
    %26 = vector.load %arg4[%c0_21, %c0_22] : memref<8x128xf32, #tpu.memory_space<vmem>>, vector<8x128xf32>
    tpu.vector_store %arg4[%c0_21, %c0_22], %25 {strides = array<i32>} : memref<8x128xf32, #tpu.memory_space<vmem>>, vector<8x128xf32>,
    return
  }
  func.func @transform_0(%arg0: i32) -> (i32, i32) {
    %c0_i32 = arith.constant 0 : i32
    %c0_i32_0 = arith.constant 0 : i32
    return %arg0, %c0_i32 : i32, i32
  }
  func.func @transform_1(%arg0: i32) -> (i32, i32, i32) {
    %c0_i32 = arith.constant 0 : i32
    %c0_i32_0 = arith.constant 0 : i32
    %c0_i32_1 = arith.constant 0 : i32
    %c0_i32_2 = arith.constant 0 : i32
    return %c0_i32, %c0_i32_0, %c0_i32_1 : i32, i32, i32
  }
  func.func @transform_2(%arg0: i32) -> (i32, i32, i32) {
    %c0_i32 = arith.constant 0 : i32
    %c0_i32_0 = arith.constant 0 : i32
    %c0_i32_1 = arith.constant 0 : i32
    %c0_i32_2 = arith.constant 0 : i32
    return %c0_i32, %c0_i32_0, %c0_i32_1 : i32, i32, i32
  }
  func.func @transform_3(%arg0: i32) -> (i32, i32) {
    %c0_i32 = arith.constant 0 : i32
    %c0_i32_0 = arith.constant 0 : i32
    return %arg0, %c0_i32 : i32, i32
  }
}

</mosaic_0001>

<bundles_post_ra>
// kernel: tpu_custom_call.1
= control target key start
LH: loop header
LB: loop body
LE: loop exit
PB: predicated region body
PF: predicated region fallthrough
CT: control target
= control target key end

     0   :  { %8 = vsyncpa [#allocation3], 0  ;;  %s607_s0 = inlined_call_operand.hbm [shape: f32[8,8], index: 0, kind: input, shape index: {}]   ;;  %s608_s1 = inlined_call_operand.hbm [shape: f32[3,128,128], index: 1, kind: input, shape index: {}]   ;;  %s609_s2 = inlined_call_operand.vmem [shape: f32[3,1,128], index: 2, kind: input, shape index: {}]   ;;  %s610_s3 = inlined_call_operand.hbm [shape: f32[8,128], index: 3, kind: output, shape index: {}]  }
   0x1   :  { %9 = vsyncpa [#allocation6], 0 }
   0x2   :  { %10 = vsyncpa [#allocation4], 0  ;;  %s523_s12 = smov [#allocation2]   ;;  %s524_s14 = smov [#allocation5]  }
   0x3   :  { %s17_s13 = sshll.u32 %s523_s12, 4  ;;  %s26_s15 = sshll.u32 %s524_s14, 4  ;;  %s18_s13 = int_to_ptr.vmem [resolvable:$true] %s17_s13  ;;  %s27_s15 = int_to_ptr.vmem [resolvable:$true] %s26_s15 }
   0x4   :  { %s465_s16 = scalar_lea.vmem %s18_s13, 128  ;;  %p470_p1 = scmp.lt.s32.totalorder %s18_s13, %s18_s13 }
   0x5   :  { %p466_p0 = scmp.ne.s32.totalorder %s18_s13, %s465_s16  ;;  %p471_p2 = scmp.lt.s32.totalorder %s465_s16, %s465_s16 }
   0x7   :  { %p472_p3 = por %p471_p2, %p470_p1 }
   0x9   :  { %p473_p4 = pnand %p472_p3, %p466_p0 }
   0xb   :  { %476 = shalt.err (!%p473_p4)
}
   0xc   :  { %20 = dma.hbm_to_vmem [thread:$0]  %s607_s0, 128, %s18_s13, [#allocation3]  }
   0xd   :  { %s485_s19 = scalar_lea.vmem %s27_s15, 6144  ;;  %p490_p6 = scmp.lt.s32.totalorder %s27_s15, %s27_s15 }
   0xe   :  { %p486_p5 = scmp.ne.s32.totalorder %s27_s15, %s485_s19  ;;  %p491_p7 = scmp.lt.s32.totalorder %s485_s19, %s485_s19 }
  0x10   :  { %p492_p8 = por %p491_p7, %p490_p6 }
  0x12   :  { %p493_p9 = pnand %p492_p8, %p486_p5 }
  0x14   :  { %496 = shalt.err (!%p493_p9)
}
  0x15   :  { %s525_s20 = smov 128   ;;  %s526_s21 = smov 8  }
  0x16   :  { %32 = dma.hbm_to_vmem [thread:$0]  %s608_s1, 6144, %s27_s15, [#allocation6], %s525_s20, %s525_s20, %s526_s21  }
  0x17   :  { %517 = dma.done.wait [#allocation3], 128  }
  0x18   :  { %518 = vsyncadd [#allocation3], 4294967168 }
  0x19   :  { %519 = dma.done.wait [#allocation6], 6144  }
  0x1a   :  { %520 = vsyncadd [#allocation6], 4294961152  ;;  %v527_v0 = vmov 0.0   ;;  %vm528_vm0 = vmmov 0   ;;  %vm50_vm1 = vcmask 64512   ;;  %v42_v1 = vld [vmem:[#allocation5] sm:$0xff] }
  0x1b   :  { %375 = vmatprep.subr.mxu0 %v527_v0  ;;  %377 = vmatprep.mubr.msk.f32.mxu0 %vm528_vm0, %v527_v0  ;;  %v41_v2 = vld [vmem:[#allocation2] sm:$0xff]  ;;  %v140_v4 = vld [vmem:[#allocation5 + $0xf0] sm:$0xff]  ;;  %v139_v5 = vld [vmem:[#allocation5 + $0xe8] sm:$0xff]  ;;  %s529_s28 = smov [#allocation7]  }
  0x1c   :  { %380 = vmatprep.subr.mxu1 %v527_v0  ;;  %412 = vmatprep.mubr.msk.f32.mxu1 %vm528_vm0, %v527_v0  ;;  %v141_v3 = vld [vmem:[#allocation5 + $0xf8] sm:$0xff]  ;;  %v138_v6 = vld [vmem:[#allocation5 + $0xe0] sm:$0xff]  ;;  %v136_v8 = vld [vmem:[#allocation5 + $0xd0] sm:$0xff]  ;;  %s323_s29 = sshll.u32 %s529_s28, 4  ;;  %s324_s29 = int_to_ptr.vmem [resolvable:$true] %s323_s29 }
  0x1d   :  { %376 = vmatpush3.msra.mxu0 %v42_v1  ;;  %381 = vmatpush3.msra.mxu1 %v141_v3  ;;  %v137_v7 = vld [vmem:[#allocation5 + $0xd8] sm:$0xff]  ;;  %v135_v9 = vld [vmem:[#allocation5 + $0xc8] sm:$0xff]  ;;  %v134_v10 = vld [vmem:[#allocation5 + $0xc0] sm:$0xff]  ;;  %s497_s30 = scalar_lea.vmem %s324_s29, 128  ;;  %p502_p11 = scmp.lt.s32.totalorder %s324_s29, %s324_s29 }
  0x1e   :  { %378 = vmatmul.mubr.msk.f32.vlgmr.msra.gmra.mxu0 %vm50_vm1, %v41_v2  ;;  %382 = vmatprep.subr.mxu1 %v527_v0  ;;  %v133_v11 = vld [vmem:[#allocation5 + $0xb8] sm:$0xff]  ;;  %v132_v12 = vld [vmem:[#allocation5 + $0xb0] sm:$0xff]  ;;  %v131_v13 = vld [vmem:[#allocation5 + $0xa8] sm:$0xff]  ;;  %p498_p10 = scmp.ne.s32.totalorder %s324_s29, %s497_s30  ;;  %p503_p12 = scmp.lt.s32.totalorder %s497_s30, %s497_s30 }
  0x1f   :  { %383 = vmatpush3.msra.mxu1 %v140_v4  ;;  %415 = vmatprep.subr.mxu0 %v527_v0  ;;  %v130_v14 = vld [vmem:[#allocation5 + $0xa0] sm:$0xff]  ;;  %v129_v15 = vld [vmem:[#allocation5 + $0x98] sm:$0xff]  ;;  %v128_v16 = vld [vmem:[#allocation5 + $0x90] sm:$0xff] }
  0x20   :  { %384 = vmatprep.subr.mxu1 %v527_v0  ;;  %447 = vmatprep.mubr.msk.f32.mxu0 %vm528_vm0, %v527_v0  ;;  %v127_v17 = vld [vmem:[#allocation5 + $0x88] sm:$0xff]  ;;  %v126_v18 = vld [vmem:[#allocation5 + $0x80] sm:$0xff]  ;;  %v237_v19 = vld [vmem:[#allocation5 + $0x178] sm:$0xff]  ;;  %p504_p13 = por %p503_p12, %p502_p11 }
  0x21   :  { %385 = vmatpush3.msra.mxu1 %v139_v5  ;;  %v236_v20 = vld [vmem:[#allocation5 + $0x170] sm:$0xff]  ;;  %416 = vmatpush3.msra.mxu0 %v237_v19  ;;  %v235_v21 = vld [vmem:[#allocation5 + $0x168] sm:$0xff]  ;;  %v234_v22 = vld [vmem:[#allocation5 + $0x160] sm:$0xff] }
  0x22   :  { %386 = vmatprep.subr.mxu1 %v527_v0  ;;  %417 = vmatprep.subr.mxu0 %v527_v0  ;;  %v233_v23 = vld [vmem:[#allocation5 + $0x158] sm:$0xff]  ;;  %v232_v24 = vld [vmem:[#allocation5 + $0x150] sm:$0xff]  ;;  %v231_v25 = vld [vmem:[#allocation5 + $0x148] sm:$0xff]  ;;  %p505_p0 = pnand %p504_p13, %p498_p10 }
  0x23   :  { %387 = vmatpush3.msra.mxu1 %v138_v6  ;;  %418 = vmatpush3.msra.mxu0 %v236_v20  ;;  %v230_v26 = vld [vmem:[#allocation5 + $0x140] sm:$0xff]  ;;  %v229_v27 = vld [vmem:[#allocation5 + $0x138] sm:$0xff]  ;;  %v228_v28 = vld [vmem:[#allocation5 + $0x130] sm:$0xff] }
  0x24   :  { %388 = vmatprep.subr.mxu1 %v527_v0  ;;  %419 = vmatprep.subr.mxu0 %v527_v0  ;;  %v227_v29 = vld [vmem:[#allocation5 + $0x128] sm:$0xff]  ;;  %v226_v30 = vld [vmem:[#allocation5 + $0x120] sm:$0xff]  ;;  %v225_v31 = vld [vmem:[#allocation5 + $0x118] sm:$0xff] }
  0x25   :  { %389 = vmatpush3.msra.mxu1 %v137_v7  ;;  %420 = vmatpush3.msra.mxu0 %v235_v21  ;;  %v333_v32 = vld [vmem:[%s609_s2] ss:$0 sm:$0xff]  ;;  %v224_v37 = vld [vmem:[#allocation5 + $0x110] sm:$0xff]  ;;  %v223_v38 = vld [vmem:[#allocation5 + $0x108] sm:$0xff] }
  0x26   :  { %390 = vmatprep.subr.mxu1 %v527_v0  ;;  %421 = vmatprep.subr.mxu0 %v527_v0  ;;  %v222_v39 = vld [vmem:[#allocation5 + $0x100] sm:$0xff]  ;;  %v336_v40 = vld [vmem:[%s609_s2 + $0x1] ss:$0 sm:$0xff]  ;;  %v338_v45 = vld [vmem:[%s609_s2 + $0x2] ss:$0 sm:$0xff] }
  0x27   :  { %391 = vmatpush3.msra.mxu1 %v136_v8  ;;  %422 = vmatpush3.msra.mxu0 %v234_v22 }
  0x28   :  { %392 = vmatprep.subr.mxu1 %v527_v0  ;;  %423 = vmatprep.subr.mxu0 %v527_v0 }
  0x29   :  { %393 = vmatpush3.msra.mxu1 %v135_v9  ;;  %424 = vmatpush3.msra.mxu0 %v233_v23 }
  0x2a   :  { %394 = vmatprep.subr.mxu1 %v527_v0  ;;  %425 = vmatprep.subr.mxu0 %v527_v0 }
  0x2b   :  { %395 = vmatpush3.msra.mxu1 %v134_v10  ;;  %426 = vmatpush3.msra.mxu0 %v232_v24 }
  0x2c   :  { %396 = vmatprep.subr.mxu1 %v527_v0  ;;  %427 = vmatprep.subr.mxu0 %v527_v0 }
  0x2d   :  { %397 = vmatpush3.msra.mxu1 %v133_v11  ;;  %428 = vmatpush3.msra.mxu0 %v231_v25 }
  0x2e   :  { %398 = vmatprep.subr.mxu1 %v527_v0  ;;  %429 = vmatprep.subr.mxu0 %v527_v0 }
  0x2f   :  { %399 = vmatpush3.msra.mxu1 %v132_v12  ;;  %430 = vmatpush3.msra.mxu0 %v230_v26 }
  0x30   :  { %400 = vmatprep.subr.mxu1 %v527_v0  ;;  %431 = vmatprep.subr.mxu0 %v527_v0 }
  0x31   :  { %401 = vmatpush3.msra.mxu1 %v131_v13  ;;  %432 = vmatpush3.msra.mxu0 %v229_v27 }
  0x32   :  { %402 = vmatprep.subr.mxu1 %v527_v0  ;;  %433 = vmatprep.subr.mxu0 %v527_v0 }
  0x33   :  { %403 = vmatpush3.msra.mxu1 %v130_v14  ;;  %434 = vmatpush3.msra.mxu0 %v228_v28 }
  0x34   :  { %404 = vmatprep.subr.mxu1 %v527_v0  ;;  %435 = vmatprep.subr.mxu0 %v527_v0 }
  0x35   :  { %405 = vmatpush3.msra.mxu1 %v129_v15  ;;  %436 = vmatpush3.msra.mxu0 %v227_v29 }
  0x36   :  { %406 = vmatprep.subr.mxu1 %v527_v0  ;;  %437 = vmatprep.subr.mxu0 %v527_v0 }
  0x37   :  { %407 = vmatpush3.msra.mxu1 %v128_v16  ;;  %438 = vmatpush3.msra.mxu0 %v226_v30 }
  0x38   :  { %408 = vmatprep.subr.mxu1 %v527_v0  ;;  %439 = vmatprep.subr.mxu0 %v527_v0 }
  0x39   :  { %409 = vmatpush3.msra.mxu1 %v127_v17  ;;  %440 = vmatpush3.msra.mxu0 %v225_v31 }
  0x3a   :  { %410 = vmatprep.subr.mxu1 %v527_v0  ;;  %441 = vmatprep.subr.mxu0 %v527_v0 }
  0x3b   :  { %411 = vmatpush3.msra.mxu1 %v126_v18  ;;  %442 = vmatpush3.msra.mxu0 %v224_v37 }
  0x3c   :  { %443 = vmatprep.subr.mxu0 %v527_v0 }
  0x3d   :  { %444 = vmatpush3.msra.mxu0 %v223_v38 }
  0x3e   :  { %445 = vmatprep.subr.mxu0 %v527_v0 }
  0x3f   :  { %446 = vmatpush3.msra.mxu0 %v222_v39 }
  0xde   :  { %v120_v33 = vpop.f32.mrf.mxu0 }
  0xdf   :  { %v121_v34 = vadd.f32 %v333_v32, %v120_v33 }
  0xe0   :  { %v379_v35 = vpop.f32.mrf.mxu0 }
  0xe1   :  { %v124_v36 = vmax.f32 %v121_v34, 0.0 }
  0xe3   :  { %413 = vmatmul.mubr.f32.vlgmr.msra.gmra.mxu1 %v124_v36 }
 0x1a3   :  { %v216_v41 = vpop.f32.mrf.mxu1 }
 0x1a4   :  { %v217_v42 = vadd.f32 %v336_v40, %v216_v41 }
 0x1a5   :  { %v414_v43 = vpop.f32.mrf.mxu1 }
 0x1a6   :  { %v220_v44 = vmax.f32 %v217_v42, 0.0 }
 0x1a8   :  { %448 = vmatmul.mubr.f32.vlgmr.msra.gmra.mxu0 %v220_v44 }
 0x268   :  { %v312_v46 = vpop.f32.mrf.mxu0 }
 0x269   :  { %v313_v47 = vadd.f32 %v338_v45, %v312_v46 }
 0x26a   :  { %v449_v48 = vpop.f32.mrf.mxu0 }
 0x26b   :  { %316 = vst [vmem:[#allocation7] sm:$0xff] %v313_v47 }
 0x26c   :  { %508 = shalt.err (!%p505_p0)
}
 0x26d   :  { %326 = dma.vmem_to_hbm [thread:$0]  %s324_s29, 128, %s610_s3, [#allocation4]  }
 0x26e   :  { %521 = dma.done.wait [#allocation4], 128  }
 0x26f   :  { %522 = vsyncadd [#allocation4], 4294967168 }
 0x270   :  { %330 = vsyncpa [#allocation3], 1 }
 0x271   :  { %331 = vsyncpa [#allocation6], 1 }
 0x272   :  { %332 = vsyncpa [#allocation4], 1 }

</bundles_post_ra>
